<compile_context>
chip_gen: v7x
topology: tpu7x:2x2x1
jax: 0.10.0
libtpu: 0.0.40
codegen_flags: <defaults>
</compile_context>

<pallas_src>
import jax
import jax.numpy as jnp
from jax.experimental import pallas as pl
from jax.experimental.pallas import tpu as pltpu

EPS = 1e-5
LANE = 128


def conv_block_kernel(x_ref, scale_ref, shift_ref, w_ref, o_ref):
    # x_ref:     (Cin, T)    one batch element, a tile of H*W pixels on lanes
    # scale_ref: (Cin, 1)    precomputed gamma * rsqrt(var + eps)
    # shift_ref: (Cin, 1)    precomputed beta - mean * scale
    # w_ref:     (Cout, Cin) 1x1 conv weight (f32)
    # o_ref:     (Cout, T)
    h = x_ref[...] * scale_ref[...] + shift_ref[...]     # BatchNorm (eval), f32 VPU
    h = jnp.maximum(h, 0.0)                               # ReLU, f32 VPU
    # 1x1 conv == channel-mixing matmul; f32 operands into the MXU, f32 accum.
    o_ref[...] = jnp.dot(w_ref[...], h,
                         preferred_element_type=jnp.float32).astype(o_ref.dtype)


def _round_up(x, m):
    return ((x + m - 1) // m) * m


def _pick_tile_hw(n, c_in, c_out, hw):
    """Lane-aligned H*W tile sized by a VMEM byte budget (generation-safe)."""
    hw_lanes = _round_up(hw, LANE)
    # Bytes of VMEM per lane-column: double-buffered x (f32) + double-buffered
    # out (f32) + one f32 activation temp.  Weight / scale / shift are tiny.
    bytes_per_col = 4 * (2 * c_in + 2 * c_out + c_in)
    budget = 18 * 1024 * 1024          # leaves headroom inside a 32 MiB scoped limit
    tile_hw = (budget // bytes_per_col // LANE) * LANE
    tile_hw = max(LANE, min(tile_hw, hw_lanes))
    # v7x shards parallel grid axes over 2 TensorCores: guarantee >=2 grid
    # steps when N == 1 by splitting the H*W axis.
    if n == 1 and tile_hw >= hw_lanes and hw_lanes >= 2 * LANE:
        tile_hw = _round_up(pl.cdiv(hw_lanes, 2), LANE)
    return tile_hw


def conv2d_block(x_nchw, gamma, beta, running_mean, running_var, weight_oihw,
                 out_dtype=jnp.float32):
    """x_nchw: (N, Cin, H, W) float32. weight_oihw: (Cout, Cin, 1, 1)."""
    N, Cin, H, W = x_nchw.shape
    Cout = weight_oihw.shape[0]
    HW = H * W

    # NCHW kept as-is; flattening the spatial dims is a free (contiguous) reshape.
    x_flat = x_nchw.reshape(N, Cin, HW)

    # Eval-mode BN folded once into per-channel scale/shift (tiny f32 arrays).
    scale = (gamma * jax.lax.rsqrt(running_var + EPS)).astype(jnp.float32)
    shift = (beta - running_mean * scale).astype(jnp.float32)
    scale = scale.reshape(Cin, 1)
    shift = shift.reshape(Cin, 1)

    # 1x1 conv weight as a (Cout, Cin) channel-mixing matrix, f32.
    w = weight_oihw.reshape(Cout, Cin).astype(jnp.float32)

    tile_hw = _pick_tile_hw(N, Cin, Cout, HW)
    grid = (N, pl.cdiv(HW, tile_hw))   # ragged tail handled by masked boundary block

    out_flat = pl.pallas_call(
        conv_block_kernel,
        out_shape=jax.ShapeDtypeStruct((N, Cout, HW), out_dtype),
        grid_spec=pltpu.PrefetchScalarGridSpec(
            num_scalar_prefetch=0,
            grid=grid,
            in_specs=[
                pl.BlockSpec((None, Cin, tile_hw), lambda n, j: (n, 0, j)),  # x
                pl.BlockSpec((Cin, 1), lambda n, j: (0, 0)),                 # scale
                pl.BlockSpec((Cin, 1), lambda n, j: (0, 0)),                 # shift
                pl.BlockSpec((Cout, Cin), lambda n, j: (0, 0)),              # weight
            ],
            out_specs=pl.BlockSpec((None, Cout, tile_hw), lambda n, j: (n, 0, j)),
        ),
        compiler_params=pltpu.CompilerParams(
            dimension_semantics=("parallel", "parallel"),
            vmem_limit_bytes=32 * 1024 * 1024,
        ),
    )(x_flat, scale, shift, w)

    # Free reshape back to (N, Cout, H, W); no pad-stripping slice needed.
    return out_flat.reshape(N, Cout, H, W)


def reference(x_nchw, gamma, beta, running_mean, running_var, weight_oihw):
    # Pure-JAX f32 reference of the same math (BN eval -> ReLU -> 1x1 conv).
    g = gamma[None, :, None, None]
    b = beta[None, :, None, None]
    m = running_mean[None, :, None, None]
    v = running_var[None, :, None, None]
    h = (x_nchw - m) * g / jnp.sqrt(v + EPS) + b
    h = jnp.maximum(h, 0.0)
    w = weight_oihw.reshape(weight_oihw.shape[0], weight_oihw.shape[1])
    return jnp.einsum('nchw,oc->nohw', h, w)


if __name__ == "__main__":
    key = jax.random.PRNGKey(0)
    k_x, k_w, k_g, k_b, k_m, k_v = jax.random.split(key, 6)

    N, Cin, H, W = 2, 4, 16, 16
    Cout = 8

    x = jax.random.normal(k_x, (N, Cin, H, W), dtype=jnp.float32)
    weight = jax.random.normal(k_w, (Cout, Cin, 1, 1), dtype=jnp.float32) * 0.1
    gamma = 1.0 + 0.1 * jax.random.normal(k_g, (Cin,), dtype=jnp.float32)
    beta = 0.1 * jax.random.normal(k_b, (Cin,), dtype=jnp.float32)
    running_mean = 0.1 * jax.random.normal(k_m, (Cin,), dtype=jnp.float32)
    running_var = jnp.abs(1.0 + 0.1 * jax.random.normal(k_v, (Cin,), dtype=jnp.float32))

    # TODO(synk): training-mode BatchNorm (batch statistics + running-stat
    # updates) is not implemented; eval-mode running stats are assumed.
    out = conv2d_block(x, gamma, beta, running_mean, running_var, weight)
    out = jax.block_until_ready(out)

    ref = reference(x, gamma, beta, running_mean, running_var, weight)
    assert out.shape == (N, Cout, H, W)
    assert jnp.allclose(out, ref, atol=1e-2, rtol=1e-2)

    print("KERNEL_OK")
</pallas_src>

<mosaic_0001>
module attributes {stable_mosaic.version = 11 : i64} {
  func.func @conv_block_kernel(%arg0: i32, %arg1: i32, %arg2: memref<1x4x256xf32, #tpu.memory_space<vmem>>, %arg3: memref<4x1xf32, #tpu.memory_space<vmem>>, %arg4: memref<4x1xf32, #tpu.memory_space<vmem>>, %arg5: memref<8x4xf32, #tpu.memory_space<vmem>>, %arg6: memref<1x8x256xf32, #tpu.memory_space<vmem>>) attributes {dimension_semantics = [#tpu.dimension_semantics<parallel>, #tpu.dimension_semantics<parallel>], iteration_bounds = array<i64: 2, 1>, scalar_prefetch = 0 : i64, scratch_operands = 0 : i64, tpu.core_type = #tpu.core_type<tc>, window_params = [{transform_indices = @transform_0, window_bounds = array<i64: 1, 4, 256>}, {pipeline_mode = #tpu.pipeline_mode<synchronous>, transform_indices = @transform_1, window_bounds = array<i64: 4, 1>}, {pipeline_mode = #tpu.pipeline_mode<synchronous>, transform_indices = @transform_2, window_bounds = array<i64: 4, 1>}, {pipeline_mode = #tpu.pipeline_mode<synchronous>, transform_indices = @transform_3, window_bounds = array<i64: 8, 4>}, {transform_indices = @transform_4, window_bounds = array<i64: 1, 8, 256>}]} {
    %c0 = arith.constant 0 : index
    %c0_0 = arith.constant 0 : index
    %c0_1 = arith.constant 0 : index
    %0 = vector.load %arg2[%c0, %c0_0, %c0_1] : memref<1x4x256xf32, #tpu.memory_space<vmem>>, vector<1x4x256xf32>
    %1 = vector.shape_cast %0 : vector<1x4x256xf32> to vector<4x256xf32>
    %c0_2 = arith.constant 0 : index
    %c0_3 = arith.constant 0 : index
    %2 = vector.load %arg3[%c0_2, %c0_3] : memref<4x1xf32, #tpu.memory_space<vmem>>, vector<4x1xf32>
    %3 = vector.broadcast %2 : vector<4x1xf32> to vector<4x256xf32>
    %4 = arith.mulf %1, %3 : vector<4x256xf32>
    %c0_4 = arith.constant 0 : index
    %c0_5 = arith.constant 0 : index
    %5 = vector.load %arg4[%c0_4, %c0_5] : memref<4x1xf32, #tpu.memory_space<vmem>>, vector<4x1xf32>
    %6 = vector.broadcast %5 : vector<4x1xf32> to vector<4x256xf32>
    %7 = arith.addf %4, %6 : vector<4x256xf32>
    %cst = arith.constant 0.000000e+00 : f32
    %8 = vector.broadcast %cst : f32 to vector<4x256xf32>
    %9 = arith.maximumf %7, %8 : vector<4x256xf32>
    %c0_6 = arith.constant 0 : index
    %c0_7 = arith.constant 0 : index
    %10 = vector.load %arg5[%c0_6, %c0_7] : memref<8x4xf32, #tpu.memory_space<vmem>>, vector<8x4xf32>
    %cst_8 = arith.constant dense<0.000000e+00> : vector<8x256xf32>
    %11 = tpu.matmul %10, %9, %cst_8 {dimension_numbers = #tpu.dot_dimension_numbers<[1], [0], [0], [1], [0, 0, 1, 1], [], []>} : vector<8x4xf32>, vector<4x256xf32>, vector<8x256xf32> -> vector<8x256xf32>
    %c0_9 = arith.constant 0 : index
    %c0_10 = arith.constant 0 : index
    %c0_11 = arith.constant 0 : index
    %12 = vector.load %arg6[%c0_9, %c0_10, %c0_11] : memref<1x8x256xf32, #tpu.memory_space<vmem>>, vector<1x8x256xf32>
    %13 = vector.shape_cast %12 : vector<1x8x256xf32> to vector<8x256xf32>
    %14 = vector.shape_cast %11 : vector<8x256xf32> to vector<1x8x256xf32>
    tpu.vector_store %arg6[%c0_9, %c0_10, %c0_11], %14 {strides = array<i32>} : memref<1x8x256xf32, #tpu.memory_space<vmem>>, vector<1x8x256xf32>,
    return
  }
  func.func @transform_0(%arg0: i32, %arg1: i32) -> (i32, i32, i32) {
    %c0_i32 = arith.constant 0 : i32
    %c0_i32_0 = arith.constant 0 : i32
    return %arg0, %c0_i32, %arg1 : i32, i32, i32
  }
  func.func @transform_1(%arg0: i32, %arg1: i32) -> (i32, i32) {
    %c0_i32 = arith.constant 0 : i32
    %c0_i32_0 = arith.constant 0 : i32
    %c0_i32_1 = arith.constant 0 : i32
    return %c0_i32, %c0_i32_0 : i32, i32
  }
  func.func @transform_2(%arg0: i32, %arg1: i32) -> (i32, i32) {
    %c0_i32 = arith.constant 0 : i32
    %c0_i32_0 = arith.constant 0 : i32
    %c0_i32_1 = arith.constant 0 : i32
    return %c0_i32, %c0_i32_0 : i32, i32
  }
  func.func @transform_3(%arg0: i32, %arg1: i32) -> (i32, i32) {
    %c0_i32 = arith.constant 0 : i32
    %c0_i32_0 = arith.constant 0 : i32
    %c0_i32_1 = arith.constant 0 : i32
    return %c0_i32, %c0_i32_0 : i32, i32
  }
  func.func @transform_4(%arg0: i32, %arg1: i32) -> (i32, i32, i32) {
    %c0_i32 = arith.constant 0 : i32
    %c0_i32_0 = arith.constant 0 : i32
    return %arg0, %c0_i32, %arg1 : i32, i32, i32
  }
}

</mosaic_0001>

<bundles_post_ra>
// kernel: tpu_custom_call.1
= control target key start
LH: loop header
LB: loop body
LE: loop exit
PB: predicated region body
PF: predicated region fallthrough
CT: control target
= control target key end

     0   :  { %9 = vsyncpa [#allocation3], 0  ;;  %s742_s0 = inlined_call_operand.vmem [shape: f32[2,4,256], index: 0, kind: input, shape index: {}]   ;;  %s743_s1 = inlined_call_operand.vmem [shape: f32[4,1], index: 1, kind: input, shape index: {}]   ;;  %s744_s2 = inlined_call_operand.vmem [shape: f32[4,1], index: 2, kind: input, shape index: {}]   ;;  %s745_s3 = inlined_call_operand.vmem [shape: f32[8,4], index: 3, kind: input, shape index: {}]   ;;  %s746_s4 = inlined_call_operand.hbm [shape: f32[2,8,256], index: 4, kind: output, shape index: {}]  }
   0x1   :  { %11 = vsyncpa [#allocation3 + $0x1], 0  ;;  %s621_s15 = smov 0   ;;  %s623_s16 = smov 0  }
   0x2   :  { %s625_s17 = smov 0   ;;  %s627_s18 = smov 0  }
   0x3   :  { %s629_s19 = smov 0   ;;  %s631_s20 = smov 0  }
   0x4 LB: > { %s435_s21 = sadd.s32 4294967295, %s590_s20   ;;  %s436_s22 = sadd.s32 4294967294, %s590_s20   ;;  %s590_s20 = sphi %s631_s20, %s17_s20   ;;  %s586_s19 = sphi %s629_s19, %s753_s19   ;;  %s582_s18 = sphi %s627_s18, %s752_s18   ;;  %s578_s17 = sphi %s625_s17, %s751_s17   ;;  %s574_s16 = sphi %s623_s16, %s750_s16   ;;  %s570_s15 = sphi %s621_s15, %s749_s15  }
   0x5   : > { %s29_s23 = sadd.s32 1, %s586_s19  ;;  %s129_s24 = sadd.s32 1, %s578_s17 }
   0x6   : > { %p31_p0 = scmp.ge.s32.totalorder %s29_s23, 2  ;;  %p139_p1 = scmp.ne.s32.totalorder %s578_s17, %s574_s16 }
   0x7   : > { %p140_p2 = scmp.eq.s32.totalorder %s435_s21, 1  ;;  %p145_p3 = scmp.ne.s32.totalorder %s574_s16, %s570_s15 }
   0x8   : > { %s755_s23 = smov (%p31_p0, %s29_s23), 0  ;;  %p146_p5 = scmp.eq.s32.totalorder %s436_s22, 1 }
   0x9   : > { %p661_p4 = por %p140_p2, %p139_p1  ;;  %s124_s26 = ssub.s32 %s586_s19, %s755_s23 }
   0xa   : > { %p439_p6 = scmp.ge.s32.totalorder %s590_s20, 1  ;;  %p127_p7 = scmp.eq.s32.totalorder %s124_s26, 0 }
   0xb   : > { %p668_p8 = por %p146_p5, %p145_p3  ;;  %p186_p9 = scmp.lt.s32.totalorder %s590_s20, 3 }
   0xc   : > { %s674_s28 = scalar_select %p127_p7, %s578_s17, %s129_s24  }
   0xd   : > { %p187_p10 = pnand %p439_p6, %p186_p9 }
   0xe   : > { %v228_v0 = vld [vmem:[%s743_s1] sm:$0xf] (!%p187_p10)  ;;  %v592_v1 = vmov (!%p187_p10), 0   ;;  %v593_v3 = vmov (!%p187_p10), 0.0   ;;  %p217_p11 = scmp.lt.s32.totalorder (!%p187_p10), %s582_s18, 1  ;;  %v236_v6 = vlaneseq (!%p187_p10)  ;;  %vm264_vm0 = vcmask (!%p187_p10), 1043456  }
   0xf   : > { %190 = sbr.rel (%p187_p10) target bundleno = 385 (0x181), region = 36  ;;  %511 = vset.pattern.permute.xlu0 (!%p187_p10), %v592_v1  ;;  %v242_v2 = vld [vmem:[%s744_s2] sm:$0xf] (!%p187_p10)  ;;  %333 = vmatprep.mubr.f32.mxu0 (!%p187_p10), %v593_v3  ;;  %v594_v4 = vmov (!%p187_p10), 839922192   ;;  %vm260_vm1 = vcmask (!%p187_p10), 31744  }
  0x10   : > { %231 = vperm.xlu0 (!%p187_p10), %511, %v228_v0   ;;  %v234_v5 = vunpack.c.l.s4 (!%p187_p10), %v594_v4  ;;  %v237_v8 = vshrl.u32 (!%p187_p10), %v236_v6, 7  ;;  %v257_v19 = vld [vmem:[%s745_s3] sm:$0xff] (!%p187_p10)  ;;  %s213_s14 = sand.u32 (!%p187_p10), 1, %s574_s16   ;;  %s452_s26 = sshll.u32 (!%p187_p10), %s582_s18, 8 }
  0x11   : > { %s440_s21 = sshll.u32 (!%p187_p10), %s213_s14, 4  ;;  %s697_s5 = scalar_lea.hbm (!%p187_p10), %s746_s4, %s452_s26 }
  0x12   : > { %v235_v7 = vunpack.c.0.s8 (!%p187_p10), %v234_v5  ;;  %s215_s22 = scalar_lea.vmem (!%p187_p10), [#allocation2], %s440_s21  ;;  %s343_s6 = scalar_lea.sflag (!%p187_p10), [#allocation3], %s213_s14 }
  0x13   : > { %s359_s24 = sshll.u32 (!%p187_p10), %s215_s22, 4  ;;  %s692_s24 = int_to_ptr.vmem [resolvable:$true] %s359_s24 }
  0x14   : > { %245 = vperm.xlu0 (!%p187_p10), %511, %v242_v2   ;;  %v238_v9 = vsub.s32 (!%p187_p10), %v235_v7, %v237_v8 }
  0x16   : > { %s218_s7 = scalar_select %p217_p11, %s582_s18, 1 }
  0x17   : > { %s595_s18 = smov [#allocation2]  }
  0x18   : > { %s451_s8 = sshll.u32 %s218_s7, 3  ;;  %s512_s7 = scalar_lea.vmem %s692_s24, 256 }
  0x19   : > { %s224_s11 = scalar_lea.vmem %s742_s0, %s451_s8  ;;  %p513_p12 = scmp.ne.s32.totalorder %s692_s24, %s512_s7 }
  0x1a   : > { %v227_v12 = vld [vmem:[%s224_s11] sm:$0xff]  ;;  %s516_s8 = sshll.u32 %s595_s18, 4  ;;  %s517_s8 = int_to_ptr.vmem [resolvable:$false] %s516_s8 }
  0x1b   : > { %p514_p13 = pnand %p513_p12, %p661_p4  ;;  %s518_s9 = scalar_lea.vmem %s517_s8, 512 }
  0x1c   : > { %p519_p1 = scmp.lt.s32.totalorder %s692_s24, %s517_s8  ;;  %p520_p2 = scmp.lt.s32.totalorder %s518_s9, %s512_s7 }
  0x1d   : > { %p515_p0 = pneg %p514_p13 }
  0x1e   : > { %p521_p3 = por %p520_p2, %p519_p1 }
  0x20   : > { %p522_p5 = pnand %p521_p3, %p515_p0 }
  0x8f   : > { %v232_v10 = vpop.permute.xlu0 %231 }
  0x90   : > { %v239_v11 = vrot.slane %v232_v10, %v238_v9 }
  0x92   : > { %v241_v14 = vmul.f32 %v239_v11, %v227_v12 }
  0x93   : > { %v246_v13 = vpop.permute.xlu0 %245 }
  0x94   : > { %v253_v15 = vrot.slane %v246_v13, %v238_v9 }
  0x96   : > { %v255_v16 = vadd.f32 %v253_v15, %v241_v14 }
  0x98   : > { %v256_v17 = vmax.f32 %v255_v16, 0.0 }
  0x9a   : > { %v259_v18 = vcombine.high %v256_v17, %v256_v17 }
  0x9c   : > { %443 = vmatprep.subr.msk.mxu0 %vm264_vm0, %v259_v18 }
  0x9d   : > { %444 = vmatpush1.msk.msra.mxu0 %vm264_vm0, %v256_v17 }
  0x9e   : > { %445 = vmatmul.mubr.msk.f32.vlgmr.msra.gmra.mrb[0].mxu0 %vm260_vm1, %v257_v19 }
 0x171   : > { %v335_v20 = vpop.f32.mrb[0].mxu0 }
 0x172   : > { %340 = vst [vmem:[%s215_s22] sm:$0xff] %v335_v20  ;;  %v337_v21 = vpop.f32.mrb[1].mxu0 }
 0x173   : > { %341 = vst [vmem:[%s215_s22 + $0x8] sm:$0xff] %v337_v21 }
 0x174   : > { %525 = shalt.err (!%p522_p5)
}
 0x175   : > { %s526_s10 = scalar_lea.hbm %s697_s5, 256  ;;  %s530_s13 = scalar_lea.hbm %s746_s4, 512 }
 0x176   : > { %p527_p6 = scmp.ne.s32.totalorder %s697_s5, %s526_s10  ;;  %p531_p10 = scmp.lt.u32.totalorder %s697_s5, %s746_s4 }
 0x177   : > { %p532_p11 = scmp.lt.u32.totalorder %s530_s13, %s526_s10  ;;  %p534_p13 = scmp.lt.u32.totalorder %s526_s10, %s697_s5 }
 0x178   : > { %p528_p7 = pnand %p527_p6, %p661_p4 }
 0x179   : > { %p533_p12 = por %p532_p11, %p531_p10 }
 0x17a   : > { %p529_p9 = pneg %p528_p7 }
 0x17b   : > { %p535_p0 = por %p534_p13, %p533_p12 }
 0x17d   : > { %p536_p1 = pnand %p535_p0, %p529_p9 }
 0x17f   : > { %539 = shalt.err (!%p536_p1)
}
 0x180   : > { %453 = dma.vmem_to_hbm [thread:$0]  (%p661_p4), %s692_s24, 256, %s697_s5, %s343_s6  }
 0x181 PF: > { %p459_p2 = scmp.ge.s32.totalorder %s590_s20, 2  ;;  %s371_s22 = sand.u32 1, %s570_s15  }
 0x182   : > { %s372_s26 = scalar_lea.sflag [#allocation3], %s371_s22 }
 0x183   : > { %p456_p3 = pnand %p459_p2, %p668_p8 }
 0x185   : > { %565 = dma.done.wait (!%p456_p3), %s372_s26, 256  }
 0x186   : > { %567 = vsyncadd (!%p456_p3), %s372_s26, 4294967040  ;;  %s17_s20 = sadd.s32 1, %s590_s20   ;;  %s749_s15 = smov %s574_s16 }
 0x187   : > { %p14_p5 = scmp.ge.s32.totalorder %s17_s20, 4   ;;  %s750_s16 = smov %s578_s17 }
 0x188   : > { %s751_s17 = smov %s674_s28  ;;  %s752_s18 = smov %s586_s19 }
 0x189   : > { %s753_s19 = smov %s755_s23  ;;  %16 = sbr.rel (!%p14_p5) target bundleno = 4 (0x4), region = 71 }
 0x190   :  { %377 = vsyncpa [#allocation3], 1 }
 0x191   :  { %379 = vsyncpa [#allocation3 + $0x1], 1 }

</bundles_post_ra>
